<compile_context>
chip_gen: v7x
topology: tpu7x:2x2x1
jax: 0.10.0
libtpu: 0.0.40
codegen_flags: <defaults>
</compile_context>

<pallas_src>
import functools

import jax
import jax.numpy as jnp
from jax.experimental import pallas as pl
from jax.experimental.pallas import tpu as pltpu


def _imp_kernel(x_ref, adj_ref, w_ref, o_ref, *, tb, seq_len):
    # x_ref : (N, TB*L) f32, lane-dense, columns ordered b*L + l
    # adj_ref: (N, N)          w_ref: (N, 4N) precomposed [taps | bias block]
    # o_ref : (N, TB*L) output (same layout as x_ref)
    n = adj_ref.shape[0]
    width = x_ref.shape[1]

    # --- step 1: graph mixing + tanh for all TB batches in one MXU matmul ---
    h = jnp.tanh(jnp.dot(adj_ref[...], x_ref[...],
                         preferred_element_type=jnp.float32))      # (N, TB*L)

    # --- circular +-2 shifts, batch-local wrap (XLU lane rotations) ----------
    # NOTE: pltpu.roll acts on the logical (N, L) slice, so the wrap happens at
    # L (not at any padded lane extent); L not a multiple of 128 is correct but
    # takes a slower masked path.
    m2_parts, p2_parts = [], []
    for b in range(tb):
        hb = h[:, b * seq_len:(b + 1) * seq_len]                   # (N, L)
        m2_parts.append(pltpu.roll(hb, 2, axis=1))                 # h[(l-2) % L]
        p2_parts.append(pltpu.roll(hb, seq_len - 2, axis=1))       # h[(l+2) % L]
    h_m2 = m2_parts[0] if tb == 1 else jnp.concatenate(m2_parts, axis=1)
    h_p2 = p2_parts[0] if tb == 1 else jnp.concatenate(p2_parts, axis=1)

    # --- steps 2+3 + bias fused: contract over the 4N tap axis ---------------
    # ones block pairs with W_cat's bias block (only its first column nonzero),
    # folding the fused bias into MXU accumulation (K stays sublane-aligned).
    ones = jnp.ones((n, width), dtype=h.dtype)
    stacked = jnp.concatenate([h_m2, h, h_p2, ones], axis=0)       # (4N, TB*L)
    o_ref[...] = jnp.dot(w_ref[...], stacked,
                         preferred_element_type=jnp.float32).astype(o_ref.dtype)


def _pick_tb(batch, max_tb=8):
    """Largest divisor of `batch` that is <= max_tb (batches per grid step)."""
    tb = min(batch, max_tb)
    while batch % tb != 0:
        tb -= 1
    return tb


def imp_forward(x, adj, conv_w, conv_b, lin_w, lin_b):
    """x: (B, L, N); adj: (N, N); conv_w: (N, N, 3); conv_b: (N,);
       lin_w: (N, N); lin_b: (N,). Returns (B, L, N) in x.dtype."""
    B, L, N = x.shape
    f32 = jnp.float32
    hi = jax.lax.Precision.HIGHEST

    # --- host-side weight composition (tiny, grid-invariant) ----------------
    w0 = conv_w[:, :, 0].astype(f32)
    w1 = conv_w[:, :, 1].astype(f32)
    w2 = conv_w[:, :, 2].astype(f32)
    lw = lin_w.astype(f32)
    bias = (jnp.matmul(lw, conv_b.astype(f32), precision=hi)
            + lin_b.astype(f32))                                    # (N,)
    bias_block = jnp.concatenate(
        [bias[:, None], jnp.zeros((N, N - 1), f32)], axis=1)        # (N, N)
    w_cat = jnp.concatenate(
        [jnp.matmul(lw, w0, precision=hi),
         jnp.matmul(lw, w1, precision=hi),
         jnp.matmul(lw, w2, precision=hi),
         bias_block], axis=1)                                       # (N, 4N)

    # --- lane-dense layout: (N, B*L), columns b*L + l ------------------------
    x_flat = jnp.transpose(x, (2, 0, 1)).reshape(N, B * L).astype(f32)
    adj_c = adj.astype(f32)

    tb = _pick_tb(B)
    if (B // tb) > 1 and (tb * L) % 128 != 0:
        tb = B                     # fall back to one fat grid step (full-extent block)
    grid = (B // tb,)
    width = tb * L

    cost = pl.CostEstimate(
        flops=int(2 * B * L * N * N + 2 * B * L * N * (4 * N)),
        transcendentals=int(B * L * N),
        bytes_accessed=int(4 * (2 * B * L * N + N * N + 4 * N * N)),
    )

    kernel = functools.partial(_imp_kernel, tb=tb, seq_len=L)

    out_flat = pl.pallas_call(
        kernel,
        out_shape=jax.ShapeDtypeStruct((N, B * L), x.dtype),
        grid_spec=pltpu.PrefetchScalarGridSpec(
            num_scalar_prefetch=0,
            grid=grid,
            in_specs=[
                pl.BlockSpec((N, width), lambda i: (0, i)),      # x slab (TB batches)
                pl.BlockSpec((N, N), lambda i: (0, 0)),          # adj (resident)
                pl.BlockSpec((N, 4 * N), lambda i: (0, 0)),      # composed weights
            ],
            out_specs=pl.BlockSpec((N, width), lambda i: (0, i)),
        ),
        compiler_params=pltpu.CompilerParams(
            dimension_semantics=("parallel",)),
        cost_estimate=cost,
    )(x_flat, adj_c, w_cat)

    # back to the module's (B, L, N) layout (single cheap XLA transpose)
    return jnp.transpose(out_flat.reshape(N, B, L), (1, 2, 0))


def imp_reference(x, adj, conv_w, conv_b, lin_w, lin_b):
    """Pure-JAX reference mirroring the PyTorch forward."""
    h = jnp.tanh(jnp.einsum('blw,vw->blv', x, adj))            # (B, L, N)
    h_m2 = jnp.roll(h, 2, axis=1)    # h[:, (l-2)%L, :]
    h_p2 = jnp.roll(h, -2, axis=1)   # h[:, (l+2)%L, :]
    y = (jnp.einsum('blc,oc->blo', h_m2, conv_w[:, :, 0])
         + jnp.einsum('blc,oc->blo', h,   conv_w[:, :, 1])
         + jnp.einsum('blc,oc->blo', h_p2, conv_w[:, :, 2])
         + conv_b)
    return jnp.einsum('blm,nm->bln', y, lin_w) + lin_b


if __name__ == "__main__":
    # B batches, L sequence steps (lane axis), N graph nodes / channels.
    B, L, N = 2, 128, 8
    key = jax.random.PRNGKey(0)
    ks = jax.random.split(key, 6)

    x      = jax.random.normal(ks[0], (B, L, N), dtype=jnp.float32)
    adj    = jax.random.normal(ks[1], (N, N),    dtype=jnp.float32)
    conv_w = 0.1 * jax.random.normal(ks[2], (N, N, 3), dtype=jnp.float32)
    conv_b = 0.1 * jax.random.normal(ks[3], (N,),      dtype=jnp.float32)
    lin_w  = 0.1 * jax.random.normal(ks[4], (N, N),    dtype=jnp.float32)
    lin_b  = 0.1 * jax.random.normal(ks[5], (N,),      dtype=jnp.float32)

    ref = imp_reference(x, adj, conv_w, conv_b, lin_w, lin_b)

    out = imp_forward(x, adj, conv_w, conv_b, lin_w, lin_b)
    jax.block_until_ready(out)
    assert out.shape == (B, L, N)
    assert out.dtype == x.dtype
    err = jnp.max(jnp.abs(out - ref))
    assert jnp.allclose(out, ref, atol=2e-3, rtol=2e-3), f"max abs err = {err}"

    print("KERNEL_OK")
</pallas_src>

<mosaic_0001>
module attributes {stable_mosaic.version = 11 : i64} {
  func.func @_imp_kernel(%arg0: i32, %arg1: memref<8x256xf32, #tpu.memory_space<vmem>>, %arg2: memref<8x8xf32, #tpu.memory_space<vmem>>, %arg3: memref<8x32xf32, #tpu.memory_space<vmem>>, %arg4: memref<8x256xf32, #tpu.memory_space<vmem>>) attributes {dimension_semantics = [#tpu.dimension_semantics<parallel>], iteration_bounds = array<i64: 1>, scalar_prefetch = 0 : i64, scratch_operands = 0 : i64, tpu.core_type = #tpu.core_type<tc>, window_params = [{transform_indices = @transform_0, window_bounds = array<i64: 8, 256>}, {pipeline_mode = #tpu.pipeline_mode<synchronous>, transform_indices = @transform_1, window_bounds = array<i64: 8, 8>}, {pipeline_mode = #tpu.pipeline_mode<synchronous>, transform_indices = @transform_2, window_bounds = array<i64: 8, 32>}, {transform_indices = @transform_3, window_bounds = array<i64: 8, 256>}]} {
    %c0 = arith.constant 0 : index
    %c0_0 = arith.constant 0 : index
    %0 = vector.load %arg2[%c0, %c0_0] : memref<8x8xf32, #tpu.memory_space<vmem>>, vector<8x8xf32>
    %c0_1 = arith.constant 0 : index
    %c0_2 = arith.constant 0 : index
    %1 = vector.load %arg1[%c0_1, %c0_2] : memref<8x256xf32, #tpu.memory_space<vmem>>, vector<8x256xf32>
    %cst = arith.constant dense<0.000000e+00> : vector<8x256xf32>
    %2 = tpu.matmul %0, %1, %cst {dimension_numbers = #tpu.dot_dimension_numbers<[1], [0], [0], [1], [0, 0, 1, 1], [], []>} : vector<8x8xf32>, vector<8x256xf32>, vector<8x256xf32> -> vector<8x256xf32>
    %3 = math.tanh %2 : vector<8x256xf32>
    %4 = vector.extract_strided_slice %3 {offsets = [0, 0], sizes = [8, 128], strides = [1, 1]} : vector<8x256xf32> to vector<8x128xf32>
    %c2_i32 = arith.constant 2 : i32
    %5 = tpu.dynamic_rotate %4 by %c2_i32 dim 1 : vector<8x128xf32>, i32 -> vector<8x128xf32>
    %c126_i32 = arith.constant 126 : i32
    %6 = tpu.dynamic_rotate %4 by %c126_i32 dim 1 : vector<8x128xf32>, i32 -> vector<8x128xf32>
    %7 = vector.extract_strided_slice %3 {offsets = [0, 128], sizes = [8, 128], strides = [1, 1]} : vector<8x256xf32> to vector<8x128xf32>
    %c2_i32_3 = arith.constant 2 : i32
    %8 = tpu.dynamic_rotate %7 by %c2_i32_3 dim 1 : vector<8x128xf32>, i32 -> vector<8x128xf32>
    %c126_i32_4 = arith.constant 126 : i32
    %9 = tpu.dynamic_rotate %7 by %c126_i32_4 dim 1 : vector<8x128xf32>, i32 -> vector<8x128xf32>
    %10 = tpu.concatenate %5, %8 in 1 : vector<8x128xf32>, vector<8x128xf32> -> vector<8x256xf32>
    %11 = tpu.concatenate %6, %9 in 1 : vector<8x128xf32>, vector<8x128xf32> -> vector<8x256xf32>
    %cst_5 = arith.constant 1.000000e+00 : f32
    %12 = vector.broadcast %cst_5 : f32 to vector<8x256xf32>
    %13 = tpu.concatenate %10, %3, %11, %12 in 0 : vector<8x256xf32>, vector<8x256xf32>, vector<8x256xf32>, vector<8x256xf32> -> vector<32x256xf32>
    %c0_6 = arith.constant 0 : index
    %c0_7 = arith.constant 0 : index
    %14 = vector.load %arg3[%c0_6, %c0_7] : memref<8x32xf32, #tpu.memory_space<vmem>>, vector<8x32xf32>
    %cst_8 = arith.constant dense<0.000000e+00> : vector<8x256xf32>
    %15 = tpu.matmul %14, %13, %cst_8 {dimension_numbers = #tpu.dot_dimension_numbers<[1], [0], [0], [1], [0, 0, 1, 1], [], []>} : vector<8x32xf32>, vector<32x256xf32>, vector<8x256xf32> -> vector<8x256xf32>
    %c0_9 = arith.constant 0 : index
    %c0_10 = arith.constant 0 : index
    %16 = vector.load %arg4[%c0_9, %c0_10] : memref<8x256xf32, #tpu.memory_space<vmem>>, vector<8x256xf32>
    tpu.vector_store %arg4[%c0_9, %c0_10], %15 {strides = array<i32>} : memref<8x256xf32, #tpu.memory_space<vmem>>, vector<8x256xf32>,
    return
  }
  func.func @transform_0(%arg0: i32) -> (i32, i32) {
    %c0_i32 = arith.constant 0 : i32
    %c0_i32_0 = arith.constant 0 : i32
    return %c0_i32, %arg0 : i32, i32
  }
  func.func @transform_1(%arg0: i32) -> (i32, i32) {
    %c0_i32 = arith.constant 0 : i32
    %c0_i32_0 = arith.constant 0 : i32
    %c0_i32_1 = arith.constant 0 : i32
    return %c0_i32, %c0_i32_0 : i32, i32
  }
  func.func @transform_2(%arg0: i32) -> (i32, i32) {
    %c0_i32 = arith.constant 0 : i32
    %c0_i32_0 = arith.constant 0 : i32
    %c0_i32_1 = arith.constant 0 : i32
    return %c0_i32, %c0_i32_0 : i32, i32
  }
  func.func @transform_3(%arg0: i32) -> (i32, i32) {
    %c0_i32 = arith.constant 0 : i32
    %c0_i32_0 = arith.constant 0 : i32
    return %c0_i32, %arg0 : i32, i32
  }
}

</mosaic_0001>

<bundles_post_ra>
// kernel: tpu_custom_call.1
= control target key start
LH: loop header
LB: loop body
LE: loop exit
PB: predicated region body
PF: predicated region fallthrough
CT: control target
= control target key end

     0   :  { %8 = vsyncpa [#allocation3], 0  ;;  %s434_s0 = inlined_call_operand.hbm [shape: f32[8,256], index: 0, kind: input, shape index: {}]   ;;  %s435_s1 = inlined_call_operand.hbm [shape: f32[8,8], index: 1, kind: input, shape index: {}]   ;;  %s436_s2 = inlined_call_operand.hbm [shape: f32[8,32], index: 2, kind: input, shape index: {}]   ;;  %s437_s3 = inlined_call_operand.hbm [shape: f32[8,256], index: 3, kind: output, shape index: {}]  }
   0x1   :  { %9 = vsyncpa [#allocation6], 0 }
   0x2   :  { %10 = vsyncpa [#allocation4], 0  ;;  %s358_s12 = smov [#allocation5]   ;;  %s359_s14 = smov [#allocation2]  }
   0x3   :  { %s27_s13 = sshll.u32 %s358_s12, 4  ;;  %s17_s15 = sshll.u32 %s359_s14, 4  ;;  %s28_s13 = int_to_ptr.vmem [resolvable:$true] %s27_s13  ;;  %s18_s15 = int_to_ptr.vmem [resolvable:$true] %s17_s15 }
   0x4   :  { %s264_s18 = scalar_lea.hbm %s435_s1, 128 }
   0x5   :  { %p265_p0 = scmp.ne.s32.totalorder %s435_s1, %s264_s18  ;;  %p268_p1 = scmp.lt.u32.totalorder %s264_s18, %s435_s1 }
   0x7   :  { %p270_p2 = pnand %p268_p1, %p265_p0 }
   0x9   :  { %273 = shalt.err (!%p270_p2)
}
   0xa   :  { %s274_s23 = scalar_lea.vmem %s28_s13, 128  ;;  %p279_p4 = scmp.lt.s32.totalorder %s28_s13, %s28_s13 }
   0xb   :  { %p275_p3 = scmp.ne.s32.totalorder %s28_s13, %s274_s23  ;;  %p280_p5 = scmp.lt.s32.totalorder %s274_s23, %s274_s23 }
   0xd   :  { %p281_p6 = por %p280_p5, %p279_p4 }
   0xf   :  { %p282_p7 = pnand %p281_p6, %p275_p3 }
  0x11   :  { %285 = shalt.err (!%p282_p7)
}
  0x12   :  { %30 = dma.hbm_to_vmem [thread:$0]  %s435_s1, 128, %s28_s13, [#allocation6]  }
  0x13   :  { %s286_s28 = scalar_lea.hbm %s434_s0, 256 }
  0x14   :  { %p287_p8 = scmp.ne.s32.totalorder %s434_s0, %s286_s28  ;;  %p290_p9 = scmp.lt.u32.totalorder %s286_s28, %s434_s0 }
  0x16   :  { %p292_p10 = pnand %p290_p9, %p287_p8 }
  0x18   :  { %295 = shalt.err (!%p292_p10)
}
  0x19   :  { %s296_s6 = scalar_lea.vmem %s18_s15, 256  ;;  %p301_p12 = scmp.lt.s32.totalorder %s18_s15, %s18_s15 }
  0x1a   :  { %p297_p11 = scmp.ne.s32.totalorder %s18_s15, %s296_s6  ;;  %p302_p13 = scmp.lt.s32.totalorder %s296_s6, %s296_s6 }
  0x1c   :  { %p303_p0 = por %p302_p13, %p301_p12 }
  0x1e   :  { %p304_p1 = pnand %p303_p0, %p297_p11 }
  0x20   :  { %307 = shalt.err (!%p304_p1)
}
  0x21   :  { %20 = dma.hbm_to_vmem [thread:$0]  %s434_s0, 256, %s18_s15, [#allocation3]  }
  0x22   :  { %s360_s8 = smov [#allocation7]   ;;  %s308_s12 = scalar_lea.hbm %s436_s2, 128 }
  0x23   :  { %s37_s9 = sshll.u32 %s360_s8, 4  ;;  %p309_p2 = scmp.ne.s32.totalorder %s436_s2, %s308_s12  ;;  %s38_s9 = int_to_ptr.vmem [resolvable:$true] %s37_s9 }
  0x24   :  { %p312_p3 = scmp.lt.u32.totalorder %s308_s12, %s436_s2 }
  0x26   :  { %p314_p4 = pnand %p312_p3, %p309_p2 }
  0x28   :  { %317 = shalt.err (!%p314_p4)
}
  0x29   :  { %s318_s18 = scalar_lea.vmem %s38_s9, 128  ;;  %p323_p6 = scmp.lt.s32.totalorder %s38_s9, %s38_s9 }
  0x2a   :  { %p319_p5 = scmp.ne.s32.totalorder %s38_s9, %s318_s18  ;;  %p324_p7 = scmp.lt.s32.totalorder %s318_s18, %s318_s18 }
  0x2c   :  { %p325_p8 = por %p324_p7, %p323_p6 }
  0x2e   :  { %p326_p9 = pnand %p325_p8, %p319_p5 }
  0x30   :  { %329 = shalt.err (!%p326_p9)
}
  0x31   :  { %40 = dma.hbm_to_vmem [thread:$0]  %s436_s2, 128, %s38_s9, [#allocation6]  }
  0x32   :  { %352 = dma.done.wait [#allocation3], 256  }
  0x33   :  { %353 = vsyncadd [#allocation3], 4294967040 }
  0x34   :  { %354 = dma.done.wait [#allocation6], 256  }
  0x35   :  { %355 = vsyncadd [#allocation6], 4294967040  ;;  %v361_v0 = vmov 0.0   ;;  %v52_v1 = vld [vmem:[#allocation2 + $0x8] sm:$0xff]  ;;  %v51_v2 = vld [vmem:[#allocation2] sm:$0xff]  ;;  %vm53_vm0 = vcmask 64512  }
  0x36   :  { %121 = vmatprep.mubr.f32.mxu0 %v361_v0  ;;  %207 = vmatprep.mubr.f32.mxu1 %v361_v0  ;;  %v50_v3 = vld [vmem:[#allocation5] sm:$0xff]  ;;  %s362_s2 = smov 2   ;;  %s363_s19 = smov 126   ;;  %v364_v17 = vmov 1.0   ;;  %v138_v20 = vld [vmem:[#allocation7] sm:$0xff]  ;;  %vm139_vm1 = vcmask 261120  }
  0x37   :  { %57 = vmatprep.subr.mxu0 %v52_v1  ;;  %s365_s20 = smov [#allocation8]  }
  0x38   :  { %58 = vmatpush1.msra.mxu0 %v51_v2  ;;  %s222_s21 = sshll.u32 %s365_s20, 4  ;;  %s223_s21 = int_to_ptr.vmem [resolvable:$true] %s222_s21 }
  0x39   :  { %232 = vmatmul.mubr.msk.f32.vlgmr.msra.gmra.mrb[0].mxu0 %vm53_vm0, %v50_v3  ;;  %s330_s22 = scalar_lea.vmem %s223_s21, 256  ;;  %p335_p11 = scmp.lt.s32.totalorder %s223_s21, %s223_s21 }
  0x3a   :  { %p331_p10 = scmp.ne.s32.totalorder %s223_s21, %s330_s22  ;;  %p336_p12 = scmp.lt.s32.totalorder %s330_s22, %s330_s22 }
  0x3c   :  { %p337_p13 = por %p336_p12, %p335_p11 }
  0x3e   :  { %p338_p0 = pnand %p337_p13, %p331_p10 }
 0x10c   :  { %v123_v4 = vpop.f32.mrb[0].mxu0 }
 0x10d   :  { %260 = vtanh.f32 %v123_v4  ;;  %v125_v5 = vpop.f32.mrb[1].mxu0 }
 0x10e   :  { %262 = vtanh.f32 %v125_v5 }
 0x117   :  { %v261_v6 = vpop.eup %260 }
 0x118   :  { %v263_v7 = vpop.eup %262 }
 0x119   :  { %v250_v8 = vpack.i.bf16 %v261_v6, %v263_v7 }
 0x11b   :  { %251 = vrot.lane.b32.xlu0 %v250_v8, %s362_s2 }
 0x11f   :  { %256 = vrot.lane.b32.xlu0 %v250_v8, %s363_s19 }
 0x18d   :  { %v252_v9 = vpop.permute.xlu0 %251 }
 0x18e   :  { %v254_v10 = vunpack.i.h.bf16 %v252_v9  ;;  %v253_v11 = vunpack.i.l.bf16 %v252_v9 }
 0x190   :  { %v234_v12 = vpack.c.bf16 %v263_v7, %v253_v11  ;;  %v236_v13 = vpack.c.bf16 %v261_v6, %v254_v10 }
 0x191   :  { %v257_v14 = vpop.permute.xlu0 %256 }
 0x192   :  { %v259_v15 = vunpack.i.h.bf16 %v257_v14  ;;  %v258_v16 = vunpack.i.l.bf16 %v257_v14  ;;  %235 = vmatprep.subr.bf16.mxu1 %v234_v12 }
 0x193   :  { %237 = vmatpush1.bf16.msra.mxu1 %v236_v13 }
 0x194   :  { %v240_v18 = vpack.c.bf16 %v364_v17, %v259_v15  ;;  %v238_v19 = vpack.c.bf16 %v364_v17, %v258_v16 }
 0x196   :  { %239 = vmatprep.subr.bf16.mxu1 %v238_v19 }
 0x197   :  { %241 = vmatpush1.bf16.msra.mxu1 %v240_v18 }
 0x19a   :  { %233 = vmatmul.mubr.msk.f32.vlgmr.msra.gmra.mrb[0].mxu1 %vm139_vm1, %v138_v20 }
 0x26d   :  { %v209_v21 = vpop.f32.mrb[0].mxu1 }
 0x26e   :  { %214 = vst [vmem:[#allocation8] sm:$0xff] %v209_v21  ;;  %v211_v22 = vpop.f32.mrb[1].mxu1 }
 0x26f   :  { %215 = vst [vmem:[#allocation8 + $0x8] sm:$0xff] %v211_v22 }
 0x270   :  { %341 = shalt.err (!%p338_p0)
}
 0x271   :  { %s342_s25 = scalar_lea.hbm %s437_s3, 256 }
 0x272   :  { %p343_p1 = scmp.ne.s32.totalorder %s437_s3, %s342_s25  ;;  %p346_p2 = scmp.lt.u32.totalorder %s342_s25, %s437_s3 }
 0x274   :  { %p348_p3 = pnand %p346_p2, %p343_p1 }
 0x276   :  { %351 = shalt.err (!%p348_p3)
}
 0x277   :  { %225 = dma.vmem_to_hbm [thread:$0]  %s223_s21, 256, %s437_s3, [#allocation4]  }
 0x278   :  { %356 = dma.done.wait [#allocation4], 256  }
 0x279   :  { %357 = vsyncadd [#allocation4], 4294967040 }
 0x27a   :  { %229 = vsyncpa [#allocation3], 1 }
 0x27b   :  { %230 = vsyncpa [#allocation6], 1 }
 0x27c   :  { %231 = vsyncpa [#allocation4], 1 }

</bundles_post_ra>
